<compile_context>
chip_gen: v7x
topology: tpu7x:2x2x1
jax: 0.10.0
libtpu: 0.0.40
codegen_flags: <defaults>
</compile_context>

<pallas_src>
import functools

import jax
import jax.numpy as jnp
from jax import lax
from jax.experimental import pallas as pl
from jax.experimental.pallas import tpu as pltpu


def _round_up(x, m):
    return (x + m - 1) // m * m


def _cdiv(a, b):
    return (a + b - 1) // b


def _lth_dense_kernel(assign_ref, target_ref, out_ref, *, batch_size):
    """One batch tile: fold rows of where(t>0 & row valid, log(a)*t, 0)."""
    a = assign_ref[...].astype(jnp.float32)          # [TILE_B, C]
    t = target_ref[...].astype(jnp.float32)          # [TILE_B, C]
    tb, c = a.shape
    # Global row index; masks the ragged tail rows of the last grid step
    # (their VMEM contents are undefined — never let them reach the sum).
    row = pl.program_id(0) * tb + lax.broadcasted_iota(jnp.int32, (tb, c), 0)
    valid = (t > 0.0) & (row < batch_size)
    contrib = jnp.where(valid, jnp.log(a) * t, 0.0)
    # Fold sublane row-blocks into an (8, C) partial (pure VPU adds).
    out_ref[...] = contrib.reshape(tb // 8, 8, c).sum(axis=0)


def _lth_label_kernel(label_ref, assign_ref, out_ref, *, batch_size):
    """Hard-label fast path: one-hot mask built in-kernel, no target stream."""
    a = assign_ref[...].astype(jnp.float32)          # [TILE_B, C]
    lbl = label_ref[...]                             # [TILE_B, 1] int32
    tb, c = a.shape
    col = lax.broadcasted_iota(jnp.int32, (tb, c), 1)
    row = pl.program_id(0) * tb + lax.broadcasted_iota(jnp.int32, (tb, c), 0)
    valid = (col == lbl) & (row < batch_size)
    contrib = jnp.where(valid, jnp.log(a), 0.0)
    out_ref[...] = contrib.reshape(tb // 8, 8, c).sum(axis=0)


def _choose_tile_b(batch_size, phys_row_bytes):
    # Double-buffered *physical* (lane-padded) input footprint budget.
    input_vmem_budget = 24 * 1024 * 1024
    tile_b = (input_vmem_budget // 2) // max(phys_row_bytes, 1)
    tile_b = max(8, min(8192, (tile_b // 8) * 8))
    tile_b = min(tile_b, _round_up(batch_size, 8))
    # v7x has 2 TensorCores: keep >= 2 grid steps when the batch allows so the
    # "parallel" grid axis can shard across both cores.
    if batch_size > 8 and _cdiv(batch_size, tile_b) < 2:
        tile_b = max(8, _round_up(_cdiv(batch_size, 2), 8))
    return tile_b


def lth_net_loss(hashcodes, assignments, targets, beta, gamma,
                 num_per_class, epoch, maxIter, labels=None):
    """JAX/Pallas equivalent of LTHNetLoss.forward (returns loss_class_balanced).

    `num_per_class` is the `mapping` dict flattened into a [num_classes] array
    (mapping[str(j)] -> num_per_class[j]).  `hashcodes`, `gamma`, `epoch`,
    `maxIter` do not affect the returned value (matching the PyTorch module:
    its loss_cross_entropy is dead code and is not returned).

    If `labels` (int [B]) is given, the dense `targets` stream is skipped and
    the one-hot mask is built in-kernel — valid only for hard labels.
    """
    del hashcodes, gamma, epoch, maxIter
    batch_size, num_classes = assignments.shape
    beta = float(beta)

    # ---- balance factor: O(C) setup, done once in plain JAX -----------------
    counts = num_per_class.astype(jnp.float32)
    # 1 - beta**n computed cancellation-free as -expm1(n * log(beta)).
    denom = -jnp.expm1(counts * jnp.log(jnp.float32(beta)))
    safe = counts > 0
    bf = jnp.where(safe, (1.0 - beta) / jnp.where(safe, denom, 1.0), 0.0)
    bf_max = jnp.max(bf)
    bf = jnp.where(bf_max > 0, bf / bf_max, bf)      # all-zero-counts guard

    # ---- tile sizing (physical, lane-padded bytes per row) ------------------
    a_bytes = jnp.dtype(assignments.dtype).itemsize
    c_phys = _round_up(num_classes, 128)
    if labels is None:
        t_bytes = jnp.dtype(targets.dtype).itemsize
        phys_row = c_phys * (a_bytes + t_bytes)
    else:
        phys_row = c_phys * a_bytes + 128 * 4        # + lane-padded int32 label
    tile_b = _choose_tile_b(batch_size, phys_row)
    grid_b = _cdiv(batch_size, tile_b)

    out_shape = jax.ShapeDtypeStruct((grid_b * 8, num_classes), jnp.float32)
    out_spec = pl.BlockSpec((8, num_classes), lambda i: (i, 0))
    assign_spec = pl.BlockSpec((tile_b, num_classes), lambda i: (i, 0))
    cparams = pltpu.CompilerParams(
        dimension_semantics=("parallel",),
        vmem_limit_bytes=32 * 1024 * 1024)

    if labels is None:
        partials = pl.pallas_call(
            functools.partial(_lth_dense_kernel, batch_size=batch_size),
            out_shape=out_shape,
            grid=(grid_b,),
            in_specs=[assign_spec,
                      pl.BlockSpec((tile_b, num_classes), lambda i: (i, 0))],
            out_specs=out_spec,
            compiler_params=cparams,
        )(assignments, targets)
    else:
        lbl2d = labels.reshape(batch_size, 1).astype(jnp.int32)
        partials = pl.pallas_call(
            functools.partial(_lth_label_kernel, batch_size=batch_size),
            out_shape=out_shape,
            grid=(grid_b,),
            in_specs=[pl.BlockSpec((tile_b, 1), lambda i: (i, 0)),
                      assign_spec],
            out_specs=out_spec,
            compiler_params=cparams,
        )(lbl2d, assignments)

    # Tiny O(grid_b*8*C) reduction; weight multiply, minus sign and /batch_size
    # are applied here (hoisted out of the per-element path).
    per_class = jnp.sum(partials, axis=0)            # [num_classes]
    return -jnp.sum(per_class * bf) / batch_size


if __name__ == "__main__":
    import numpy as np

    def reference_loss(assignments, targets, beta, num_per_class):
        counts64 = np.asarray(num_per_class, dtype=np.float64)
        bf_ref = (1.0 - beta) / (1.0 - beta ** counts64)
        bf_ref = bf_ref / bf_ref.max()
        w = jnp.asarray(bf_ref, dtype=jnp.float32)[None, :]
        b = assignments.shape[0]
        return jnp.sum(-jnp.log(assignments) * targets * w) / b

    key = jax.random.PRNGKey(0)

    # ---- test 1: shapes consistent with the module (B=8, C=16, L=32) --------
    k1, k2, k3, k4, k5 = jax.random.split(key, 5)
    batch_size, num_classes, code_length = 8, 16, 32

    hashcodes = jnp.tanh(jax.random.normal(k1, (batch_size, code_length),
                                           dtype=jnp.float32))
    logits = jax.random.normal(k2, (batch_size, num_classes), dtype=jnp.float32)
    assignments = jax.nn.softmax(logits, axis=-1)
    labels = jax.random.randint(k3, (batch_size,), 0, num_classes)
    targets = jax.nn.one_hot(labels, num_classes, dtype=jnp.float32)
    num_per_class = jnp.array(
        [100, 80, 64, 50, 40, 32, 25, 20, 16, 12, 10, 8, 6, 5, 4, 3],
        dtype=jnp.float32)
    beta, gamma, epoch, maxIter = 0.999, 0.5, 1, 10

    loss_dense = jax.block_until_ready(
        lth_net_loss(hashcodes, assignments, targets, beta, gamma,
                     num_per_class, epoch, maxIter))
    loss_label = jax.block_until_ready(
        lth_net_loss(hashcodes, assignments, targets, beta, gamma,
                     num_per_class, epoch, maxIter, labels=labels))
    ref1 = reference_loss(assignments, targets, beta, num_per_class)
    assert jnp.allclose(loss_dense, ref1, rtol=1e-4, atol=1e-6), (loss_dense, ref1)
    assert jnp.allclose(loss_label, ref1, rtol=1e-4, atol=1e-6), (loss_label, ref1)

    # ---- test 2: ragged batch / ragged class dims (exercise in-kernel masks) -
    batch2, classes2 = 13, 10
    logits2 = jax.random.normal(k4, (batch2, classes2), dtype=jnp.float32)
    assign2 = jax.nn.softmax(logits2, axis=-1)
    labels2 = jax.random.randint(k5, (batch2,), 0, classes2)
    targets2 = jax.nn.one_hot(labels2, classes2, dtype=jnp.float32)
    counts2 = jnp.array([90, 70, 55, 40, 30, 22, 15, 10, 6, 3], dtype=jnp.float32)
    hash2 = jnp.zeros((batch2, code_length), dtype=jnp.float32)

    loss2_dense = jax.block_until_ready(
        lth_net_loss(hash2, assign2, targets2, beta, gamma,
                     counts2, epoch, maxIter))
    loss2_label = jax.block_until_ready(
        lth_net_loss(hash2, assign2, targets2, beta, gamma,
                     counts2, epoch, maxIter, labels=labels2))
    ref2 = reference_loss(assign2, targets2, beta, counts2)
    assert jnp.allclose(loss2_dense, ref2, rtol=1e-4, atol=1e-6), (loss2_dense, ref2)
    assert jnp.allclose(loss2_label, ref2, rtol=1e-4, atol=1e-6), (loss2_label, ref2)

    print("KERNEL_OK")
</pallas_src>

<mosaic_0001>
module attributes {stable_mosaic.version = 11 : i64} {
  func.func @_lth_dense_kernel(%arg0: i32, %arg1: memref<8x16xf32, #tpu.memory_space<vmem>>, %arg2: memref<8x16xf32, #tpu.memory_space<vmem>>, %arg3: memref<8x16xf32, #tpu.memory_space<vmem>>) attributes {dimension_semantics = [#tpu.dimension_semantics<parallel>], iteration_bounds = array<i64: 1>, scalar_prefetch = 0 : i64, scratch_operands = 0 : i64, tpu.core_type = #tpu.core_type<tc>, window_params = [{transform_indices = @transform_0, window_bounds = array<i64: 8, 16>}, {transform_indices = @transform_1, window_bounds = array<i64: 8, 16>}, {transform_indices = @transform_2, window_bounds = array<i64: 8, 16>}]} {
    %c0 = arith.constant 0 : index
    %c0_0 = arith.constant 0 : index
    %0 = vector.load %arg1[%c0, %c0_0] : memref<8x16xf32, #tpu.memory_space<vmem>>, vector<8x16xf32>
    %c0_1 = arith.constant 0 : index
    %c0_2 = arith.constant 0 : index
    %1 = vector.load %arg2[%c0_1, %c0_2] : memref<8x16xf32, #tpu.memory_space<vmem>>, vector<8x16xf32>
    %c8_i32 = arith.constant 8 : i32
    %2 = arith.muli %arg0, %c8_i32 : i32
    %3 = tpu.iota {dimensions = array<i32: 0>} : vector<8x16xi32>
    %4 = vector.broadcast %2 : i32 to vector<8x16xi32>
    %5 = arith.addi %4, %3 : vector<8x16xi32>
    %cst = arith.constant 0.000000e+00 : f32
    %6 = vector.broadcast %cst : f32 to vector<8x16xf32>
    %7 = arith.cmpf ogt, %1, %6 : vector<8x16xf32>
    %c8_i32_3 = arith.constant 8 : i32
    %8 = vector.broadcast %c8_i32_3 : i32 to vector<8x16xi32>
    %9 = arith.cmpi slt, %5, %8 : vector<8x16xi32>
    %10 = arith.andi %7, %9 : vector<8x16xi1>
    %11 = math.log %0 : vector<8x16xf32>
    %12 = arith.mulf %11, %1 : vector<8x16xf32>
    %cst_4 = arith.constant 0.000000e+00 : f32
    %13 = vector.broadcast %cst_4 : f32 to vector<8x16xf32>
    %14 = arith.select %10, %12, %13 : vector<8x16xi1>, vector<8x16xf32>
    %15 = vector.shape_cast %14 : vector<8x16xf32> to vector<1x8x16xf32>
    %cst_5 = arith.constant dense<0.000000e+00> : vector<8x16xf32>
    %16 = vector.multi_reduction <add>, %15, %cst_5 [0] : vector<1x8x16xf32> to vector<8x16xf32>
    %c0_6 = arith.constant 0 : index
    %c0_7 = arith.constant 0 : index
    %17 = vector.load %arg3[%c0_6, %c0_7] : memref<8x16xf32, #tpu.memory_space<vmem>>, vector<8x16xf32>
    tpu.vector_store %arg3[%c0_6, %c0_7], %16 {strides = array<i32>} : memref<8x16xf32, #tpu.memory_space<vmem>>, vector<8x16xf32>,
    return
  }
  func.func @transform_0(%arg0: i32) -> (i32, i32) {
    %c0_i32 = arith.constant 0 : i32
    %c0_i32_0 = arith.constant 0 : i32
    return %arg0, %c0_i32 : i32, i32
  }
  func.func @transform_1(%arg0: i32) -> (i32, i32) {
    %c0_i32 = arith.constant 0 : i32
    %c0_i32_0 = arith.constant 0 : i32
    return %arg0, %c0_i32 : i32, i32
  }
  func.func @transform_2(%arg0: i32) -> (i32, i32) {
    %c0_i32 = arith.constant 0 : i32
    %c0_i32_0 = arith.constant 0 : i32
    return %arg0, %c0_i32 : i32, i32
  }
}

</mosaic_0001>

<bundles_post_ra>
// kernel: tpu_custom_call.1
= control target key start
LH: loop header
LB: loop body
LE: loop exit
PB: predicated region body
PF: predicated region fallthrough
CT: control target
= control target key end

     0   :  { %7 = vsyncpa [#allocation3], 0  ;;  %s200_s0 = inlined_call_operand.hbm [shape: f32[8,16], index: 0, kind: input, shape index: {}]   ;;  %s201_s1 = inlined_call_operand.hbm [shape: f32[8,16], index: 1, kind: input, shape index: {}]   ;;  %s202_s2 = inlined_call_operand.hbm [shape: f32[8,16], index: 2, kind: output, shape index: {}]  }
   0x1   :  { %8 = vsyncpa [#allocation6], 0 }
   0x2   :  { %9 = vsyncpa [#allocation4], 0  ;;  %s146_s9 = smov [#allocation2]   ;;  %s147_s11 = smov [#allocation5]  }
   0x3   :  { %s16_s10 = sshll.u32 %s146_s9, 4  ;;  %s26_s12 = sshll.u32 %s147_s11, 4  ;;  %s17_s10 = int_to_ptr.vmem [resolvable:$true] %s16_s10  ;;  %s27_s12 = int_to_ptr.vmem [resolvable:$true] %s26_s12 }
   0x4   :  { %s74_s15 = scalar_lea.hbm %s200_s0, 128 }
   0x5   :  { %p75_p0 = scmp.ne.s32.totalorder %s200_s0, %s74_s15  ;;  %p78_p1 = scmp.lt.u32.totalorder %s74_s15, %s200_s0 }
   0x7   :  { %p80_p2 = pnand %p78_p1, %p75_p0 }
   0x9   :  { %83 = shalt.err (!%p80_p2)
}
   0xa   :  { %s84_s20 = scalar_lea.vmem %s17_s10, 128  ;;  %p89_p4 = scmp.lt.s32.totalorder %s17_s10, %s17_s10 }
   0xb   :  { %p85_p3 = scmp.ne.s32.totalorder %s17_s10, %s84_s20  ;;  %p90_p5 = scmp.lt.s32.totalorder %s84_s20, %s84_s20 }
   0xd   :  { %p91_p6 = por %p90_p5, %p89_p4 }
   0xf   :  { %p92_p7 = pnand %p91_p6, %p85_p3 }
  0x11   :  { %95 = shalt.err (!%p92_p7)
}
  0x12   :  { %19 = dma.hbm_to_vmem [thread:$0]  %s200_s0, 128, %s17_s10, [#allocation3]  }
  0x13   :  { %s96_s25 = scalar_lea.hbm %s201_s1, 128 }
  0x14   :  { %p97_p8 = scmp.ne.s32.totalorder %s201_s1, %s96_s25  ;;  %p100_p9 = scmp.lt.u32.totalorder %s96_s25, %s201_s1 }
  0x16   :  { %p102_p10 = pnand %p100_p9, %p97_p8 }
  0x18   :  { %105 = shalt.err (!%p102_p10)
}
  0x19   :  { %s106_s30 = scalar_lea.vmem %s27_s12, 128  ;;  %p111_p12 = scmp.lt.s32.totalorder %s27_s12, %s27_s12 }
  0x1a   :  { %p107_p11 = scmp.ne.s32.totalorder %s27_s12, %s106_s30  ;;  %p112_p13 = scmp.lt.s32.totalorder %s106_s30, %s106_s30 }
  0x1c   :  { %p113_p0 = por %p112_p13, %p111_p12 }
  0x1e   :  { %p114_p1 = pnand %p113_p0, %p107_p11 }
  0x20   :  { %117 = shalt.err (!%p114_p1)
}
  0x21   :  { %29 = dma.hbm_to_vmem [thread:$0]  %s201_s1, 128, %s27_s12, [#allocation6]  }
  0x22   :  { %140 = dma.done.wait [#allocation3], 128  }
  0x23   :  { %141 = vsyncadd [#allocation3], 4294967168 }
  0x24   :  { %142 = dma.done.wait [#allocation6], 128  }
  0x25   :  { %143 = vsyncadd [#allocation6], 4294967168  ;;  %v36_v0 = vld [vmem:[#allocation2] sm:$0xff]  ;;  %v37_v1 = vld [vmem:[#allocation5] sm:$0xff]  ;;  %s148_s4 = smov [#allocation7]   ;;  %vm51_vm1 = vcmask 130048  }
  0x26   :  { %72 = vlog2.f32 %v36_v0  ;;  %s59_s5 = sshll.u32 %s148_s4, 4  ;;  %vm43_vm0 = vcmp.gt.f32.partialorder %v37_v1, 0.0  ;;  %s60_s5 = int_to_ptr.vmem [resolvable:$true] %s59_s5 }
  0x27   :  { %s118_s6 = scalar_lea.vmem %s60_s5, 128  ;;  %p123_p3 = scmp.lt.s32.totalorder %s60_s5, %s60_s5 }
  0x28   :  { %p119_p2 = scmp.ne.s32.totalorder %s60_s5, %s118_s6  ;;  %p124_p4 = scmp.lt.s32.totalorder %s118_s6, %s118_s6 }
  0x2a   :  { %p125_p5 = por %p124_p4, %p123_p3 }
  0x2c   :  { %p126_p6 = pnand %p125_p5, %p119_p2 }
  0x30   :  { %v73_v2 = vpop.eup %72 }
  0x31   :  { %v47_v3 = vmul.f32 0.6931472, %v73_v2 }
  0x33   :  { %v48_v4 = vmul.f32 %v47_v3, %v37_v1 }
  0x35   :  { %v49_v5 = vsel %vm43_vm0, %v48_v4, 0.0 }
  0x36   :  { %52 = vst.msk [vmem:[#allocation7] sm:$0xff] %vm51_vm1, %v49_v5 }
  0x37   :  { %129 = shalt.err (!%p126_p6)
}
  0x38   :  { %s130_s8 = scalar_lea.hbm %s202_s2, 128 }
  0x39   :  { %p131_p7 = scmp.ne.s32.totalorder %s202_s2, %s130_s8  ;;  %p134_p8 = scmp.lt.u32.totalorder %s130_s8, %s202_s2 }
  0x3b   :  { %p136_p9 = pnand %p134_p8, %p131_p7 }
  0x3d   :  { %139 = shalt.err (!%p136_p9)
}
  0x3e   :  { %62 = dma.vmem_to_hbm [thread:$0]  %s60_s5, 128, %s202_s2, [#allocation4]  }
  0x3f   :  { %144 = dma.done.wait [#allocation4], 128  }
  0x40   :  { %145 = vsyncadd [#allocation4], 4294967168 }
  0x41   :  { %66 = vsyncpa [#allocation3], 1 }
  0x42   :  { %67 = vsyncpa [#allocation6], 1 }
  0x43   :  { %68 = vsyncpa [#allocation4], 1 }

</bundles_post_ra>
